<compile_context>
chip_gen: v7x
topology: tpu7x:2x2x1
jax: 0.10.0
libtpu: 0.0.40
codegen_flags: <defaults>
</compile_context>

<pallas_src>
import functools

import jax
import jax.numpy as jnp
from jax.experimental import pallas as pl
from jax.experimental.pallas import tpu as pltpu


def _round_up(x: int, m: int) -> int:
    return ((x + m - 1) // m) * m


def fused_linear_kernel(x_ref, w_ref, b_ref, o_ref):
    """o = x @ W + b  with W already in (in_features, out_features) layout."""
    y = jnp.dot(x_ref[...], w_ref[...], preferred_element_type=jnp.float32)
    o_ref[...] = (y + b_ref[...]).astype(o_ref.dtype)


def prepare_params(wa, ba, wb, bb, *, lane: int = 128):
    """One-time parameter fusion + layout prep (do NOT repeat per forward call).

    wa, wb: (out_features, in_features)  -- PyTorch nn.Linear layout
    ba, bb: (out_features,)

    Returns:
      w_pad: (K_pad, N_pad)  fused weight, pre-transposed to (in, out), zero-padded
             so both dims are multiples of 128 (lane-dense MXU operands/stores).
      b_pad: (1, N_pad)      fused bias, zero-padded.
      dims:  (in_features, out_features) original logical dims.
    """
    f_out, f_in = wa.shape
    assert wb.shape == (f_out, f_in)
    assert ba.shape == (f_out,) and bb.shape == (f_out,)

    k_pad = _round_up(f_in, lane)
    n_pad = _round_up(f_out, lane)

    w = (wa + wb).T                                   # (in, out): transpose once, here
    w_pad = jnp.pad(w, ((0, k_pad - f_in), (0, n_pad - f_out)))
    b = (ba + bb).reshape(1, f_out)
    b_pad = jnp.pad(b, ((0, 0), (0, n_pad - f_out)))
    return w_pad, b_pad, (f_in, f_out)


@functools.partial(jax.jit, static_argnames=("dims", "tile_b"))
def test_module_forward(x, w_pad, b_pad, dims, *, tile_b: int = 2048):
    """x: (B, in_features); w_pad: (K_pad, N_pad); b_pad: (1, N_pad)."""
    f_in, f_out = dims
    B = x.shape[0]
    assert x.shape[1] == f_in
    k_pad, n_pad = w_pad.shape
    assert b_pad.shape == (1, n_pad)

    # Pad batch to a sublane multiple and features to the lane-dense padded width.
    b_rows = _round_up(max(B, 8), 8)
    if (b_rows, k_pad) != x.shape:
        x = jnp.pad(x, ((0, b_rows - B), (0, k_pad - f_in)))

    # Batch tile selection:
    #  - bounded (keeps per-step VMEM constant + double-buffered pipeline alive)
    #  - >= 2 grid points when B >= 16 so v7x's two TCs split the "parallel" axis
    #    (harmless on v5e/v6e: just one extra ~0.35 us grid step).
    tile = min(tile_b, b_rows)
    if b_rows >= 16:
        half = max(8, ((b_rows // 2) // 8) * 8)
        tile = min(tile, half)
    grid = (pl.cdiv(b_rows, tile),)

    # Explicit VMEM budget: double-buffered x/out tiles + resident (double-buffered) W/b.
    itemsize = 4
    vmem_bytes = (2 * tile * (k_pad + n_pad) * itemsize
                  + 2 * (k_pad * n_pad + n_pad) * itemsize
                  + (2 << 20))                       # slack
    vmem_bytes = int(min(max(vmem_bytes, 4 << 20), 100 << 20))

    out_pad = pl.pallas_call(
        fused_linear_kernel,
        out_shape=jax.ShapeDtypeStruct((b_rows, n_pad), x.dtype),
        grid=grid,
        in_specs=[
            pl.BlockSpec((tile, k_pad), lambda i: (i, 0)),    # x: tiled over batch
            pl.BlockSpec((k_pad, n_pad), lambda i: (0, 0)),   # W: resident
            pl.BlockSpec((1, n_pad), lambda i: (0, 0)),       # b: resident
        ],
        out_specs=pl.BlockSpec((tile, n_pad), lambda i: (i, 0)),
        compiler_params=pltpu.CompilerParams(
            dimension_semantics=("parallel",),   # v7x: split batch across 2 TCs
            vmem_limit_bytes=vmem_bytes,
        ),
    )(x, w_pad, b_pad)

    # Slice the lane-padded slab back to the logical output shape.
    return out_pad[:B, :f_out]


if __name__ == "__main__":
    key = jax.random.PRNGKey(0)
    k_x, k_wa, k_ba, k_wb, k_bb = jax.random.split(key, 5)

    B, F = 8, 10
    bound = 1.0 / (F ** 0.5)  # emulate PyTorch Linear default init range
    x = jax.random.normal(k_x, (B, F), dtype=jnp.float32)
    wa = jax.random.uniform(k_wa, (F, F), minval=-bound, maxval=bound, dtype=jnp.float32)
    ba = jax.random.uniform(k_ba, (F,), minval=-bound, maxval=bound, dtype=jnp.float32)
    wb = jax.random.uniform(k_wb, (F, F), minval=-bound, maxval=bound, dtype=jnp.float32)
    bb = jax.random.uniform(k_bb, (F,), minval=-bound, maxval=bound, dtype=jnp.float32)

    # One-time parameter fusion / transpose / lane-padding (outside the hot path).
    w_fused, b_fused, dims = prepare_params(wa, ba, wb, bb)

    out = jax.block_until_ready(test_module_forward(x, w_fused, b_fused, dims))

    # Reference in plain JAX with the ORIGINAL (unfused) parameters,
    # i.e. exact PyTorch forward semantics: a(x) + b(x).
    ref = (x @ wa.T + ba) + (x @ wb.T + bb)
    assert out.shape == (B, F), out.shape
    assert jnp.allclose(out, ref, atol=1e-5, rtol=1e-5), "mismatch vs reference"
    print("KERNEL_OK")
</pallas_src>

<mosaic_0001>
module attributes {stable_mosaic.version = 11 : i64} {
  func.func @fused_linear_kernel(%arg0: i32, %arg1: memref<8x128xf32, #tpu.memory_space<vmem>>, %arg2: memref<128x128xf32, #tpu.memory_space<vmem>>, %arg3: memref<1x128xf32, #tpu.memory_space<vmem>>, %arg4: memref<8x128xf32, #tpu.memory_space<vmem>>) attributes {dimension_semantics = [#tpu.dimension_semantics<parallel>], iteration_bounds = array<i64: 1>, scalar_prefetch = 0 : i64, scratch_operands = 0 : i64, tpu.core_type = #tpu.core_type<tc>, window_params = [{transform_indices = @transform_0, window_bounds = array<i64: 8, 128>}, {pipeline_mode = #tpu.pipeline_mode<synchronous>, transform_indices = @transform_1, window_bounds = array<i64: 128, 128>}, {pipeline_mode = #tpu.pipeline_mode<synchronous>, transform_indices = @transform_2, window_bounds = array<i64: 1, 128>}, {transform_indices = @transform_3, window_bounds = array<i64: 8, 128>}]} {
    %c0 = arith.constant 0 : index
    %c0_0 = arith.constant 0 : index
    %0 = vector.load %arg1[%c0, %c0_0] : memref<8x128xf32, #tpu.memory_space<vmem>>, vector<8x128xf32>
    %c0_1 = arith.constant 0 : index
    %c0_2 = arith.constant 0 : index
    %1 = vector.load %arg2[%c0_1, %c0_2] : memref<128x128xf32, #tpu.memory_space<vmem>>, vector<128x128xf32>
    %cst = arith.constant dense<0.000000e+00> : vector<8x128xf32>
    %2 = tpu.matmul %0, %1, %cst {dimension_numbers = #tpu.dot_dimension_numbers<[1], [0], [0], [1], [0, 0, 1, 1], [], []>} : vector<8x128xf32>, vector<128x128xf32>, vector<8x128xf32> -> vector<8x128xf32>
    %c0_3 = arith.constant 0 : index
    %c0_4 = arith.constant 0 : index
    %3 = vector.load %arg3[%c0_3, %c0_4] : memref<1x128xf32, #tpu.memory_space<vmem>>, vector<1x128xf32>
    %4 = vector.broadcast %3 : vector<1x128xf32> to vector<8x128xf32>
    %5 = arith.addf %2, %4 : vector<8x128xf32>
    %c0_5 = arith.constant 0 : index
    %c0_6 = arith.constant 0 : index
    %6 = vector.load %arg4[%c0_5, %c0_6] : memref<8x128xf32, #tpu.memory_space<vmem>>, vector<8x128xf32>
    tpu.vector_store %arg4[%c0_5, %c0_6], %5 {strides = array<i32>} : memref<8x128xf32, #tpu.memory_space<vmem>>, vector<8x128xf32>,
    return
  }
  func.func @transform_0(%arg0: i32) -> (i32, i32) {
    %c0_i32 = arith.constant 0 : i32
    %c0_i32_0 = arith.constant 0 : i32
    return %arg0, %c0_i32 : i32, i32
  }
  func.func @transform_1(%arg0: i32) -> (i32, i32) {
    %c0_i32 = arith.constant 0 : i32
    %c0_i32_0 = arith.constant 0 : i32
    %c0_i32_1 = arith.constant 0 : i32
    return %c0_i32, %c0_i32_0 : i32, i32
  }
  func.func @transform_2(%arg0: i32) -> (i32, i32) {
    %c0_i32 = arith.constant 0 : i32
    %c0_i32_0 = arith.constant 0 : i32
    %c0_i32_1 = arith.constant 0 : i32
    return %c0_i32, %c0_i32_0 : i32, i32
  }
  func.func @transform_3(%arg0: i32) -> (i32, i32) {
    %c0_i32 = arith.constant 0 : i32
    %c0_i32_0 = arith.constant 0 : i32
    return %arg0, %c0_i32 : i32, i32
  }
}

</mosaic_0001>

<bundles_post_ra>
// kernel: test_module_forward.1
= control target key start
LH: loop header
LB: loop body
LE: loop exit
PB: predicated region body
PF: predicated region fallthrough
CT: control target
= control target key end

     0   :  { %8 = vsyncpa [#allocation3], 0  ;;  %s328_s0 = inlined_call_operand.vmem [shape: f32[8,128], index: 0, kind: input, shape index: {}]   ;;  %s329_s1 = inlined_call_operand.hbm [shape: f32[128,128], index: 1, kind: input, shape index: {}]   ;;  %s330_s2 = inlined_call_operand.vmem [shape: f32[1,128], index: 2, kind: input, shape index: {}]   ;;  %s331_s3 = inlined_call_operand.hbm [shape: f32[8,128], index: 3, kind: output, shape index: {}]  }
   0x1   :  { %9 = vsyncpa [#allocation4], 0  ;;  %s271_s12 = smov [#allocation2]   ;;  %s223_s16 = scalar_lea.hbm %s329_s1, 2048 }
   0x2   :  { %s17_s13 = sshll.u32 %s271_s12, 4  ;;  %p224_p0 = scmp.ne.s32.totalorder %s329_s1, %s223_s16  ;;  %s18_s13 = int_to_ptr.vmem [resolvable:$true] %s17_s13 }
   0x3   :  { %p227_p1 = scmp.lt.u32.totalorder %s223_s16, %s329_s1 }
   0x5   :  { %p229_p2 = pnand %p227_p1, %p224_p0 }
   0x7   :  { %232 = shalt.err (!%p229_p2)
}
   0x8   :  { %s233_s21 = scalar_lea.vmem %s18_s13, 2048  ;;  %p238_p4 = scmp.lt.s32.totalorder %s18_s13, %s18_s13 }
   0x9   :  { %p234_p3 = scmp.ne.s32.totalorder %s18_s13, %s233_s21  ;;  %p239_p5 = scmp.lt.s32.totalorder %s233_s21, %s233_s21 }
   0xb   :  { %p240_p6 = por %p239_p5, %p238_p4 }
   0xd   :  { %p241_p7 = pnand %p240_p6, %p234_p3 }
   0xf   :  { %244 = shalt.err (!%p241_p7)
}
  0x10   :  { %s272_s22 = smov 128   ;;  %s273_s23 = smov 8  }
  0x11   :  { %23 = dma.hbm_to_vmem [thread:$0]  %s329_s1, 2048, %s18_s13, [#allocation3], %s272_s22, %s272_s22, %s273_s23  }
  0x12   :  { %267 = dma.done.wait [#allocation3], 2048  }
  0x13   :  { %268 = vsyncadd [#allocation3], 4294965248  ;;  %v274_v0 = vmov 0.0|0.0   ;;  %vm275_vm0 = vmmov 0   ;;  %v276_v1 = vmov 0.0   ;;  %v30_v2 = vld [vmem:[#allocation2] sm:$0xff] }
  0x14   :  { %192 = vmatprep.subr.bf16.mxu0 %v274_v0  ;;  %189 = vmatprep.mubr.msk.f32.mxu0 %vm275_vm0, %v276_v1  ;;  %v31_v3 = vld [vmem:[#allocation2 + $0x8] sm:$0xff]  ;;  %v32_v4 = vld [vmem:[#allocation2 + $0x10] sm:$0xff]  ;;  %v33_v6 = vld [vmem:[#allocation2 + $0x18] sm:$0xff]  ;;  %s277_s29 = smov [#allocation5]  }
  0x15   :  { %v193_v5 = vpack.c.bf16 %v31_v3, %v30_v2  ;;  %v196_v7 = vpack.c.bf16 %v33_v6, %v32_v4  ;;  %v34_v8 = vld [vmem:[#allocation2 + $0x20] sm:$0xff]  ;;  %v35_v9 = vld [vmem:[#allocation2 + $0x28] sm:$0xff]  ;;  %v36_v11 = vld [vmem:[#allocation2 + $0x30] sm:$0xff]  ;;  %s130_s30 = sshll.u32 %s277_s29, 4  ;;  %s131_s30 = int_to_ptr.vmem [resolvable:$true] %s130_s30 }
  0x16   :  { %v199_v10 = vpack.c.bf16 %v35_v9, %v34_v8  ;;  %v37_v12 = vld [vmem:[#allocation2 + $0x38] sm:$0xff]  ;;  %v38_v14 = vld [vmem:[#allocation2 + $0x40] sm:$0xff]  ;;  %v39_v15 = vld [vmem:[#allocation2 + $0x48] sm:$0xff]  ;;  %s245_s4 = scalar_lea.vmem %s131_s30, 128  ;;  %p250_p9 = scmp.lt.s32.totalorder %s131_s30, %s131_s30 }
  0x17   :  { %194 = vmatpush3.bf16.msra.mxu0 %v193_v5  ;;  %v202_v13 = vpack.c.bf16 %v37_v12, %v36_v11  ;;  %v205_v16 = vpack.c.bf16 %v39_v15, %v38_v14  ;;  %v40_v17 = vld [vmem:[#allocation2 + $0x50] sm:$0xff]  ;;  %v41_v18 = vld [vmem:[#allocation2 + $0x58] sm:$0xff]  ;;  %v42_v20 = vld [vmem:[#allocation2 + $0x60] sm:$0xff]  ;;  %p246_p8 = scmp.ne.s32.totalorder %s131_s30, %s245_s4  ;;  %p251_p10 = scmp.lt.s32.totalorder %s245_s4, %s245_s4 }
  0x18   :  { %195 = vmatprep.subr.bf16.mxu0 %v274_v0  ;;  %v208_v19 = vpack.c.bf16 %v41_v18, %v40_v17  ;;  %v43_v21 = vld [vmem:[#allocation2 + $0x68] sm:$0xff]  ;;  %v44_v23 = vld [vmem:[#allocation2 + $0x70] sm:$0xff]  ;;  %v45_v24 = vld [vmem:[#allocation2 + $0x78] sm:$0xff] }
  0x19   :  { %v211_v22 = vpack.c.bf16 %v43_v21, %v42_v20  ;;  %v214_v25 = vpack.c.bf16 %v45_v24, %v44_v23  ;;  %v29_v26 = vld [vmem:[%s328_s0] sm:$0xff]  ;;  %p252_p11 = por %p251_p10, %p250_p9 }
  0x1a   :  { %v139_v27 = vld [vmem:[%s330_s2] ss:$0 sm:$0xff] }
  0x1b   :  { %197 = vmatpush3.bf16.msra.mxu0 %v196_v7  ;;  %p253_p12 = pnand %p252_p11, %p246_p8 }
  0x1c   :  { %198 = vmatprep.subr.bf16.mxu0 %v274_v0 }
  0x1f   :  { %200 = vmatpush3.bf16.msra.mxu0 %v199_v10 }
  0x20   :  { %201 = vmatprep.subr.bf16.mxu0 %v274_v0 }
  0x23   :  { %203 = vmatpush3.bf16.msra.mxu0 %v202_v13 }
  0x24   :  { %204 = vmatprep.subr.bf16.mxu0 %v274_v0 }
  0x27   :  { %206 = vmatpush3.bf16.msra.mxu0 %v205_v16 }
  0x28   :  { %207 = vmatprep.subr.bf16.mxu0 %v274_v0 }
  0x2b   :  { %209 = vmatpush3.bf16.msra.mxu0 %v208_v19 }
  0x2c   :  { %210 = vmatprep.subr.bf16.mxu0 %v274_v0 }
  0x2f   :  { %212 = vmatpush3.bf16.msra.mxu0 %v211_v22 }
  0x30   :  { %213 = vmatprep.subr.bf16.mxu0 %v274_v0 }
  0x33   :  { %215 = vmatpush3.bf16.msra.mxu0 %v214_v25 }
  0x36   :  { %190 = vmatmul.mubr.f32.vlgmr.msra.gmra.mrb[0].mxu0 %v29_v26 }
 0x109   :  { %v119_v28 = vpop.f32.mrb[0].mxu0 }
 0x10a   :  { %v120_v29 = vadd.f32 %v139_v27, %v119_v28  ;;  %v191_v30 = vpop.f32.mrb[1].mxu0 }
 0x10c   :  { %123 = vst [vmem:[#allocation5] sm:$0xff] %v120_v29 }
 0x10d   :  { %256 = shalt.err (!%p253_p12)
}
 0x10e   :  { %s257_s6 = scalar_lea.hbm %s331_s3, 128 }
 0x10f   :  { %p258_p13 = scmp.ne.s32.totalorder %s331_s3, %s257_s6  ;;  %p261_p0 = scmp.lt.u32.totalorder %s257_s6, %s331_s3 }
 0x111   :  { %p263_p1 = pnand %p261_p0, %p258_p13 }
 0x113   :  { %266 = shalt.err (!%p263_p1)
}
 0x114   :  { %133 = dma.vmem_to_hbm [thread:$0]  %s131_s30, 128, %s331_s3, [#allocation4]  }
 0x115   :  { %269 = dma.done.wait [#allocation4], 128  }
 0x116   :  { %270 = vsyncadd [#allocation4], 4294967168 }
 0x117   :  { %137 = vsyncpa [#allocation3], 1 }
 0x118   :  { %138 = vsyncpa [#allocation4], 1 }

</bundles_post_ra>
